<compile_context>
chip_gen: v7x
topology: tpu7x:2x2x1
jax: 0.10.0
libtpu: 0.0.40
codegen_flags: <defaults>
</compile_context>

<pallas_src>
import jax
import jax.numpy as jnp
from jax.experimental import pallas as pl
from jax.experimental.pallas import tpu as pltpu


def _state_critic_kernel(x_ref, wcat_ref, bcat_ref, vrep_ref, w3t_ref,
                         dense_wt_ref, dense_b_ref, lin_w_ref, lin_b_ref,
                         out_ref):
    x = x_ref[...]                                # (TB, S, Cs+1): [static | dyn1]
    TB, S, C1 = x.shape
    wcat = wcat_ref[...]                          # (Cs+1, 2H)
    H = wcat.shape[-1] // 2

    # Fused encoders + decoder pre-activation: one tiny-K MXU matmul.
    y = jnp.dot(x.reshape(TB * S, C1), wcat,
                preferred_element_type=jnp.float32) + bcat_ref[...]   # (TB*S, 2H)
    sh = y[:, :H].reshape(TB, S, H)               # static encoder hidden (readout)
    A = y[:, H:].reshape(TB, S, H)                # sh@W1^T + dh@W2^T (loop-invariant)

    vrep = vrep_ref[...]                          # (H, H): every column == v
    w3_t = w3t_ref[...]                           # (H, H)

    def attend(u):                                # u: (TB, S, H)
        # v-reduction on the MXU; logit comes out replicated across lanes,
        # which is the layout the softmax and the prob*sh readout want.
        logit = jnp.dot(u.reshape(TB * S, H), vrep,
                        preferred_element_type=jnp.float32).reshape(TB, S, H)
        m = jnp.max(logit, axis=1, keepdims=True)            # sublane reduce (S=8)
        ex = jnp.exp(logit - m)
        denom = jnp.sum(ex, axis=1, keepdims=True)
        prob = ex * pl.reciprocal(denom, approx=True)         # softmax over seq
        return jnp.sum(prob * sh, axis=1)                     # (TB, H)

    # Decoder iteration 0 peeled: hy == 0  ->  u = tanh(A).
    hy = attend(jnp.tanh(A))
    for _ in range(2):
        c_vec = jnp.dot(hy, w3_t, preferred_element_type=jnp.float32)  # (TB, H)
        hy = attend(jnp.tanh(A + c_vec[:, None, :]))

    o1 = jnp.dot(hy, dense_wt_ref[...],
                 preferred_element_type=jnp.float32) + dense_b_ref[...]  # dense
    o1 = jnp.maximum(o1, 0.0)                                            # relu
    out_row = jnp.sum(o1 * lin_w_ref[...], axis=-1)[None, :] + lin_b_ref[...]  # (1,TB)
    out_ref[0] = out_row                                                 # lane-dense


def _choose_tb(B, max_tb):
    """>=2 grid steps whenever B > 8 (v7x megacore), sublane-aligned, capped."""
    if B <= 8:
        return B
    tb = -(-B // 2)            # ceil(B/2)
    tb = -(-tb // 8) * 8       # round up to a multiple of 8
    return min(tb, max_tb)


def state_critic_forward(static, dynamic, p, *, max_tb=256):
    """static, dynamic: (B, C, S) float32 (PyTorch NCS layout). Returns (B, 1)."""
    B, Cs, S = static.shape
    Cd = dynamic.shape[1]
    H = p["W"].shape[0]
    assert H == 128, "original torch module hardcodes hy width 128 == hidden_size"
    assert Cd >= 2, "model reads dynamic[:, 1]"

    # batch blocking
    TB = _choose_tb(B, max_tb)
    n_blocks = -(-B // TB)
    B_pad = n_blocks * TB

    # --- input prep: concat static channels with dynamic[:,1] (only channel read)
    static_t = jnp.transpose(static, (0, 2, 1)).astype(jnp.float32)      # (B, S, Cs)
    dyn1 = jnp.transpose(dynamic[:, 1:2, :], (0, 2, 1)).astype(jnp.float32)  # (B, S, 1)
    x_cat = jnp.concatenate([static_t, dyn1], axis=-1)                   # (B, S, Cs+1)
    if B_pad != B:
        x_cat = jnp.pad(x_cat, ((0, B_pad - B), (0, 0), (0, 0)))

    # --- offline weight folding
    W1t = p["W"][:, :H].T                     # (H, H)
    W2t = p["W"][:, H:2 * H].T                # (H, H)
    W3t = p["W"][:, 2 * H:].T                 # (H, H)
    ws_t = p["Ws"].T                          # (Cs, H)
    bs = p["bs"][None, :]                     # (1, H)
    wfs = ws_t @ W1t                          # (Cs, H)
    wfd = p["Wd"].sum(axis=1)[None, :] @ W2t  # (1, H): dyn1 broadcast over Cd channels
    bf = bs @ W1t + p["bd"][None, :] @ W2t    # (1, H)

    # fused (Cs+1, 2H): cols [0:H] produce sh, cols [H:2H] produce A
    w_sh = jnp.concatenate([ws_t, jnp.zeros((1, H), jnp.float32)], axis=0)  # (Cs+1, H)
    w_a = jnp.concatenate([wfs, wfd], axis=0)                               # (Cs+1, H)
    wcat = jnp.concatenate([w_sh, w_a], axis=1)                             # (Cs+1, 2H)
    bcat = jnp.concatenate([bs, bf], axis=1)                                # (1, 2H)

    vrep = jnp.broadcast_to(p["v"][:, None], (H, H)).astype(jnp.float32)    # (H, H)
    dense_wt = p["denseW"].T                  # (128, H)
    dense_b = p["dense_b"][None, :]           # (1, H)
    lin_w = p["linW"]                         # (1, H)
    lin_b = p["lin_b"].reshape(1, 1)          # (1, 1)

    const2 = lambda b: (0, 0)
    in_specs = [
        pl.BlockSpec((TB, S, Cs + 1), lambda b: (b, 0, 0)),   # fused encoder input
        pl.BlockSpec((Cs + 1, 2 * H), const2),                # fused encoder weight
        pl.BlockSpec((1, 2 * H), const2),                     # fused encoder bias
        pl.BlockSpec((H, H), const2),                         # lane-replicated v
        pl.BlockSpec((H, H), const2),                         # W3^T
        pl.BlockSpec((128, H), const2),                       # dense W^T
        pl.BlockSpec((1, H), const2),                         # dense bias
        pl.BlockSpec((1, H), const2),                         # linear weight
        pl.BlockSpec((1, 1), const2),                         # linear bias
    ]

    out = pl.pallas_call(
        _state_critic_kernel,
        out_shape=jax.ShapeDtypeStruct((n_blocks, 1, TB), jnp.float32),
        grid=(n_blocks,),
        in_specs=in_specs,
        out_specs=pl.BlockSpec((1, 1, TB), lambda b: (b, 0, 0)),
        compiler_params=pltpu.CompilerParams(
            dimension_semantics=("parallel",),
            vmem_limit_bytes=32 * 1024 * 1024),
    )(x_cat, wcat, bcat, vrep, W3t, dense_wt, dense_b, lin_w, lin_b)
    return out.reshape(B_pad)[:B].reshape(B, 1)


# ---------------- pure-JAX reference (mirrors the torch graph) ----------------
def reference_forward(static, dynamic, p):
    B, Cs, S = static.shape
    H = p["W"].shape[0]

    def encoder(x, w, b):  # x (B,C,S), w (H,C), b (H,)
        return jnp.einsum("hc,bcs->bhs", w, x) + b[None, :, None]

    sh = encoder(static, p["Ws"], p["bs"])                       # (B,H,S)
    dyn_ld = dynamic[:, 1:2, :]
    dh = encoder(jnp.broadcast_to(dyn_ld, dynamic.shape), p["Wd"], p["bd"])

    hy = jnp.zeros((B, 128), jnp.float32)
    for _ in range(3):
        hidden = jnp.concatenate(
            [sh, dh, jnp.broadcast_to(hy[:, :, None], (B, H, S))], axis=1)  # (B,3H,S)
        u = jnp.tanh(jnp.einsum("gk,bks->bgs", p["W"], hidden))             # (B,H,S)
        logit = jnp.einsum("h,bhs->bs", p["v"], u)[:, None, :]              # (B,1,S)
        prob = jax.nn.softmax(logit, axis=-1)
        hy = jnp.einsum("bos,bhs->boh", prob, sh)[:, 0, :]                  # (B,H)

    o1 = jax.nn.relu(hy @ p["denseW"].T + p["dense_b"])
    return o1 @ p["linW"].T + p["lin_b"]                                    # (B,1)


def init_params(key, static_size, dynamic_size, hidden):
    def xavier(k, shape, fan_in, fan_out):
        a = (6.0 / (fan_in + fan_out)) ** 0.5
        return jax.random.uniform(k, shape, jnp.float32, -a, a)

    ks = jax.random.split(key, 10)
    return {
        "Ws": xavier(ks[0], (hidden, static_size), static_size, hidden),
        "bs": jax.random.uniform(ks[1], (hidden,), jnp.float32, -0.1, 0.1),
        "Wd": xavier(ks[2], (hidden, dynamic_size), dynamic_size, hidden),
        "bd": jax.random.uniform(ks[3], (hidden,), jnp.float32, -0.1, 0.1),
        "v": xavier(ks[4], (hidden,), hidden, 1),
        "W": xavier(ks[5], (hidden, 3 * hidden), 3 * hidden, hidden),
        "denseW": xavier(ks[6], (hidden, 128), 128, hidden),
        "dense_b": jax.random.uniform(ks[7], (hidden,), jnp.float32, -0.1, 0.1),
        "linW": xavier(ks[8], (1, hidden), hidden, 1),
        "lin_b": jax.random.uniform(ks[9], (1,), jnp.float32, -0.1, 0.1),
    }


if __name__ == "__main__":
    STATIC_SIZE, DYNAMIC_SIZE, SEQ, HIDDEN = 2, 2, 8, 128

    key = jax.random.PRNGKey(0)
    k_static, k_dyn, k_params, k_static2, k_dyn2 = jax.random.split(key, 5)
    params = init_params(k_params, STATIC_SIZE, DYNAMIC_SIZE, HIDDEN)

    # small case (B=2): single block, TB=B
    B = 2
    static = jax.random.uniform(k_static, (B, STATIC_SIZE, SEQ), jnp.float32)
    dynamic = jax.random.uniform(k_dyn, (B, DYNAMIC_SIZE, SEQ), jnp.float32)
    out = jax.block_until_ready(state_critic_forward(static, dynamic, params))
    ref = jax.block_until_ready(reference_forward(static, dynamic, params))
    assert out.shape == (B, 1)
    assert jnp.allclose(out, ref, rtol=2e-3, atol=2e-3), (out, ref)

    # larger case (B=130): exercises TB selection (2 blocks of 72), padding
    B2 = 130
    static2 = jax.random.uniform(k_static2, (B2, STATIC_SIZE, SEQ), jnp.float32)
    dynamic2 = jax.random.uniform(k_dyn2, (B2, DYNAMIC_SIZE, SEQ), jnp.float32)
    out2 = jax.block_until_ready(state_critic_forward(static2, dynamic2, params))
    ref2 = jax.block_until_ready(reference_forward(static2, dynamic2, params))
    assert out2.shape == (B2, 1)
    assert jnp.allclose(out2, ref2, rtol=2e-3, atol=2e-3), (out2, ref2)

    print("KERNEL_OK")
</pallas_src>

<mosaic_0001>
module attributes {stable_mosaic.version = 11 : i64} {
  func.func @_state_critic_kernel(%arg0: i32, %arg1: memref<2x8x3xf32, #tpu.memory_space<vmem>>, %arg2: memref<3x256xf32, #tpu.memory_space<vmem>>, %arg3: memref<1x256xf32, #tpu.memory_space<vmem>>, %arg4: memref<128x128xf32, #tpu.memory_space<vmem>>, %arg5: memref<128x128xf32, #tpu.memory_space<vmem>>, %arg6: memref<128x128xf32, #tpu.memory_space<vmem>>, %arg7: memref<1x128xf32, #tpu.memory_space<vmem>>, %arg8: memref<1x128xf32, #tpu.memory_space<vmem>>, %arg9: memref<1x1xf32, #tpu.memory_space<vmem>>, %arg10: memref<1x1x2xf32, #tpu.memory_space<vmem>>) attributes {dimension_semantics = [#tpu.dimension_semantics<parallel>], iteration_bounds = array<i64: 1>, scalar_prefetch = 0 : i64, scratch_operands = 0 : i64, tpu.core_type = #tpu.core_type<tc>, window_params = [{transform_indices = @transform_0, window_bounds = array<i64: 2, 8, 3>}, {pipeline_mode = #tpu.pipeline_mode<synchronous>, transform_indices = @transform_1, window_bounds = array<i64: 3, 256>}, {pipeline_mode = #tpu.pipeline_mode<synchronous>, transform_indices = @transform_2, window_bounds = array<i64: 1, 256>}, {pipeline_mode = #tpu.pipeline_mode<synchronous>, transform_indices = @transform_3, window_bounds = array<i64: 128, 128>}, {pipeline_mode = #tpu.pipeline_mode<synchronous>, transform_indices = @transform_4, window_bounds = array<i64: 128, 128>}, {pipeline_mode = #tpu.pipeline_mode<synchronous>, transform_indices = @transform_5, window_bounds = array<i64: 128, 128>}, {pipeline_mode = #tpu.pipeline_mode<synchronous>, transform_indices = @transform_6, window_bounds = array<i64: 1, 128>}, {pipeline_mode = #tpu.pipeline_mode<synchronous>, transform_indices = @transform_7, window_bounds = array<i64: 1, 128>}, {pipeline_mode = #tpu.pipeline_mode<synchronous>, transform_indices = @transform_8, window_bounds = array<i64: 1, 1>}, {transform_indices = @transform_9, window_bounds = array<i64: 1, 1, 2>}]} {
    %c0 = arith.constant 0 : index
    %c0_0 = arith.constant 0 : index
    %c0_1 = arith.constant 0 : index
    %0 = vector.load %arg1[%c0, %c0_0, %c0_1] : memref<2x8x3xf32, #tpu.memory_space<vmem>>, vector<2x8x3xf32>
    %c0_2 = arith.constant 0 : index
    %c0_3 = arith.constant 0 : index
    %1 = vector.load %arg2[%c0_2, %c0_3] : memref<3x256xf32, #tpu.memory_space<vmem>>, vector<3x256xf32>
    %2 = vector.shape_cast %0 : vector<2x8x3xf32> to vector<16x3xf32>
    %cst = arith.constant dense<0.000000e+00> : vector<16x256xf32>
    %3 = tpu.matmul %2, %1, %cst {dimension_numbers = #tpu.dot_dimension_numbers<[1], [0], [0], [1], [0, 0, 1, 1], [], []>} : vector<16x3xf32>, vector<3x256xf32>, vector<16x256xf32> -> vector<16x256xf32>
    %c0_4 = arith.constant 0 : index
    %c0_5 = arith.constant 0 : index
    %4 = vector.load %arg3[%c0_4, %c0_5] : memref<1x256xf32, #tpu.memory_space<vmem>>, vector<1x256xf32>
    %5 = vector.broadcast %4 : vector<1x256xf32> to vector<16x256xf32>
    %6 = arith.addf %3, %5 : vector<16x256xf32>
    %7 = vector.extract_strided_slice %6 {offsets = [0, 0], sizes = [16, 128], strides = [1, 1]} : vector<16x256xf32> to vector<16x128xf32>
    %8 = vector.shape_cast %7 : vector<16x128xf32> to vector<2x8x128xf32>
    %9 = vector.extract_strided_slice %6 {offsets = [0, 128], sizes = [16, 128], strides = [1, 1]} : vector<16x256xf32> to vector<16x128xf32>
    %10 = vector.shape_cast %9 : vector<16x128xf32> to vector<2x8x128xf32>
    %c0_6 = arith.constant 0 : index
    %c0_7 = arith.constant 0 : index
    %11 = vector.load %arg4[%c0_6, %c0_7] : memref<128x128xf32, #tpu.memory_space<vmem>>, vector<128x128xf32>
    %c0_8 = arith.constant 0 : index
    %c0_9 = arith.constant 0 : index
    %12 = vector.load %arg5[%c0_8, %c0_9] : memref<128x128xf32, #tpu.memory_space<vmem>>, vector<128x128xf32>
    %13 = math.tanh %10 : vector<2x8x128xf32>
    %14 = vector.shape_cast %13 : vector<2x8x128xf32> to vector<16x128xf32>
    %cst_10 = arith.constant dense<0.000000e+00> : vector<16x128xf32>
    %15 = tpu.matmul %14, %11, %cst_10 {dimension_numbers = #tpu.dot_dimension_numbers<[1], [0], [0], [1], [0, 0, 1, 1], [], []>} : vector<16x128xf32>, vector<128x128xf32>, vector<16x128xf32> -> vector<16x128xf32>
    %16 = vector.shape_cast %15 : vector<16x128xf32> to vector<2x8x128xf32>
    %cst_11 = arith.constant dense<0xFF800000> : vector<2x128xf32>
    %17 = vector.multi_reduction <maximumf>, %16, %cst_11 [1] : vector<2x8x128xf32> to vector<2x128xf32>
    %18 = vector.shape_cast %17 : vector<2x128xf32> to vector<2x1x128xf32>
    %19 = vector.broadcast %18 : vector<2x1x128xf32> to vector<2x8x128xf32>
    %20 = arith.subf %16, %19 : vector<2x8x128xf32>
    %21 = math.exp %20 : vector<2x8x128xf32>
    %cst_12 = arith.constant dense<0.000000e+00> : vector<2x128xf32>
    %22 = vector.multi_reduction <add>, %21, %cst_12 [1] : vector<2x8x128xf32> to vector<2x128xf32>
    %23 = vector.shape_cast %22 : vector<2x128xf32> to vector<2x1x128xf32>
    %24 = tpu.reciprocal %23 {approx = true} : vector<2x1x128xf32> -> vector<2x1x128xf32>
    %25 = vector.broadcast %24 : vector<2x1x128xf32> to vector<2x8x128xf32>
    %26 = arith.mulf %21, %25 : vector<2x8x128xf32>
    %27 = arith.mulf %26, %8 : vector<2x8x128xf32>
    %cst_13 = arith.constant dense<0.000000e+00> : vector<2x128xf32>
    %28 = vector.multi_reduction <add>, %27, %cst_13 [1] : vector<2x8x128xf32> to vector<2x128xf32>
    %cst_14 = arith.constant dense<0.000000e+00> : vector<2x128xf32>
    %29 = tpu.matmul %28, %12, %cst_14 {dimension_numbers = #tpu.dot_dimension_numbers<[1], [0], [0], [1], [0, 0, 1, 1], [], []>} : vector<2x128xf32>, vector<128x128xf32>, vector<2x128xf32> -> vector<2x128xf32>
    %30 = vector.shape_cast %29 : vector<2x128xf32> to vector<2x1x128xf32>
    %31 = vector.broadcast %30 : vector<2x1x128xf32> to vector<2x8x128xf32>
    %32 = arith.addf %10, %31 : vector<2x8x128xf32>
    %33 = math.tanh %32 : vector<2x8x128xf32>
    %34 = vector.shape_cast %33 : vector<2x8x128xf32> to vector<16x128xf32>
    %cst_15 = arith.constant dense<0.000000e+00> : vector<16x128xf32>
    %35 = tpu.matmul %34, %11, %cst_15 {dimension_numbers = #tpu.dot_dimension_numbers<[1], [0], [0], [1], [0, 0, 1, 1], [], []>} : vector<16x128xf32>, vector<128x128xf32>, vector<16x128xf32> -> vector<16x128xf32>
    %36 = vector.shape_cast %35 : vector<16x128xf32> to vector<2x8x128xf32>
    %cst_16 = arith.constant dense<0xFF800000> : vector<2x128xf32>
    %37 = vector.multi_reduction <maximumf>, %36, %cst_16 [1] : vector<2x8x128xf32> to vector<2x128xf32>
    %38 = vector.shape_cast %37 : vector<2x128xf32> to vector<2x1x128xf32>
    %39 = vector.broadcast %38 : vector<2x1x128xf32> to vector<2x8x128xf32>
    %40 = arith.subf %36, %39 : vector<2x8x128xf32>
    %41 = math.exp %40 : vector<2x8x128xf32>
    %cst_17 = arith.constant dense<0.000000e+00> : vector<2x128xf32>
    %42 = vector.multi_reduction <add>, %41, %cst_17 [1] : vector<2x8x128xf32> to vector<2x128xf32>
    %43 = vector.shape_cast %42 : vector<2x128xf32> to vector<2x1x128xf32>
    %44 = tpu.reciprocal %43 {approx = true} : vector<2x1x128xf32> -> vector<2x1x128xf32>
    %45 = vector.broadcast %44 : vector<2x1x128xf32> to vector<2x8x128xf32>
    %46 = arith.mulf %41, %45 : vector<2x8x128xf32>
    %47 = arith.mulf %46, %8 : vector<2x8x128xf32>
    %cst_18 = arith.constant dense<0.000000e+00> : vector<2x128xf32>
    %48 = vector.multi_reduction <add>, %47, %cst_18 [1] : vector<2x8x128xf32> to vector<2x128xf32>
    %cst_19 = arith.constant dense<0.000000e+00> : vector<2x128xf32>
    %49 = tpu.matmul %48, %12, %cst_19 {dimension_numbers = #tpu.dot_dimension_numbers<[1], [0], [0], [1], [0, 0, 1, 1], [], []>} : vector<2x128xf32>, vector<128x128xf32>, vector<2x128xf32> -> vector<2x128xf32>
    %50 = vector.shape_cast %49 : vector<2x128xf32> to vector<2x1x128xf32>
    %51 = vector.broadcast %50 : vector<2x1x128xf32> to vector<2x8x128xf32>
    %52 = arith.addf %10, %51 : vector<2x8x128xf32>
    %53 = math.tanh %52 : vector<2x8x128xf32>
    %54 = vector.shape_cast %53 : vector<2x8x128xf32> to vector<16x128xf32>
    %cst_20 = arith.constant dense<0.000000e+00> : vector<16x128xf32>
    %55 = tpu.matmul %54, %11, %cst_20 {dimension_numbers = #tpu.dot_dimension_numbers<[1], [0], [0], [1], [0, 0, 1, 1], [], []>} : vector<16x128xf32>, vector<128x128xf32>, vector<16x128xf32> -> vector<16x128xf32>
    %56 = vector.shape_cast %55 : vector<16x128xf32> to vector<2x8x128xf32>
    %cst_21 = arith.constant dense<0xFF800000> : vector<2x128xf32>
    %57 = vector.multi_reduction <maximumf>, %56, %cst_21 [1] : vector<2x8x128xf32> to vector<2x128xf32>
    %58 = vector.shape_cast %57 : vector<2x128xf32> to vector<2x1x128xf32>
    %59 = vector.broadcast %58 : vector<2x1x128xf32> to vector<2x8x128xf32>
    %60 = arith.subf %56, %59 : vector<2x8x128xf32>
    %61 = math.exp %60 : vector<2x8x128xf32>
    %cst_22 = arith.constant dense<0.000000e+00> : vector<2x128xf32>
    %62 = vector.multi_reduction <add>, %61, %cst_22 [1] : vector<2x8x128xf32> to vector<2x128xf32>
    %63 = vector.shape_cast %62 : vector<2x128xf32> to vector<2x1x128xf32>
    %64 = tpu.reciprocal %63 {approx = true} : vector<2x1x128xf32> -> vector<2x1x128xf32>
    %65 = vector.broadcast %64 : vector<2x1x128xf32> to vector<2x8x128xf32>
    %66 = arith.mulf %61, %65 : vector<2x8x128xf32>
    %67 = arith.mulf %66, %8 : vector<2x8x128xf32>
    %cst_23 = arith.constant dense<0.000000e+00> : vector<2x128xf32>
    %68 = vector.multi_reduction <add>, %67, %cst_23 [1] : vector<2x8x128xf32> to vector<2x128xf32>
    %c0_24 = arith.constant 0 : index
    %c0_25 = arith.constant 0 : index
    %69 = vector.load %arg6[%c0_24, %c0_25] : memref<128x128xf32, #tpu.memory_space<vmem>>, vector<128x128xf32>
    %cst_26 = arith.constant dense<0.000000e+00> : vector<2x128xf32>
    %70 = tpu.matmul %68, %69, %cst_26 {dimension_numbers = #tpu.dot_dimension_numbers<[1], [0], [0], [1], [0, 0, 1, 1], [], []>} : vector<2x128xf32>, vector<128x128xf32>, vector<2x128xf32> -> vector<2x128xf32>
    %c0_27 = arith.constant 0 : index
    %c0_28 = arith.constant 0 : index
    %71 = vector.load %arg7[%c0_27, %c0_28] : memref<1x128xf32, #tpu.memory_space<vmem>>, vector<1x128xf32>
    %72 = vector.broadcast %71 : vector<1x128xf32> to vector<2x128xf32>
    %73 = arith.addf %70, %72 : vector<2x128xf32>
    %cst_29 = arith.constant 0.000000e+00 : f32
    %74 = vector.broadcast %cst_29 : f32 to vector<2x128xf32>
    %75 = arith.maximumf %73, %74 : vector<2x128xf32>
    %c0_30 = arith.constant 0 : index
    %c0_31 = arith.constant 0 : index
    %76 = vector.load %arg8[%c0_30, %c0_31] : memref<1x128xf32, #tpu.memory_space<vmem>>, vector<1x128xf32>
    %77 = vector.broadcast %76 : vector<1x128xf32> to vector<2x128xf32>
    %78 = arith.mulf %75, %77 : vector<2x128xf32>
    %cst_32 = arith.constant dense<0.000000e+00> : vector<2xf32>
    %79 = vector.multi_reduction <add>, %78, %cst_32 [1] : vector<2x128xf32> to vector<2xf32>
    %80 = vector.shape_cast %79 : vector<2xf32> to vector<1x2xf32>
    %c0_33 = arith.constant 0 : index
    %c0_34 = arith.constant 0 : index
    %81 = vector.load %arg9[%c0_33, %c0_34] : memref<1x1xf32, #tpu.memory_space<vmem>>, vector<1x1xf32>
    %82 = vector.broadcast %81 : vector<1x1xf32> to vector<1x2xf32>
    %83 = arith.addf %80, %82 : vector<1x2xf32>
    %c0_35 = arith.constant 0 : index
    %c0_36 = arith.constant 0 : index
    %c0_37 = arith.constant 0 : index
    %84 = vector.load %arg10[%c0_35, %c0_36, %c0_37] : memref<1x1x2xf32, #tpu.memory_space<vmem>>, vector<1x1x2xf32>
    %85 = vector.shape_cast %84 : vector<1x1x2xf32> to vector<1x2xf32>
    %86 = vector.shape_cast %83 : vector<1x2xf32> to vector<1x1x2xf32>
    tpu.vector_store %arg10[%c0_35, %c0_36, %c0_37], %86 {strides = array<i32>} : memref<1x1x2xf32, #tpu.memory_space<vmem>>, vector<1x1x2xf32>,
    return
  }
  func.func @transform_0(%arg0: i32) -> (i32, i32, i32) {
    %c0_i32 = arith.constant 0 : i32
    %c0_i32_0 = arith.constant 0 : i32
    %c0_i32_1 = arith.constant 0 : i32
    return %arg0, %c0_i32, %c0_i32_0 : i32, i32, i32
  }
  func.func @transform_1(%arg0: i32) -> (i32, i32) {
    %c0_i32 = arith.constant 0 : i32
    %c0_i32_0 = arith.constant 0 : i32
    %c0_i32_1 = arith.constant 0 : i32
    return %c0_i32, %c0_i32_0 : i32, i32
  }
  func.func @transform_2(%arg0: i32) -> (i32, i32) {
    %c0_i32 = arith.constant 0 : i32
    %c0_i32_0 = arith.constant 0 : i32
    %c0_i32_1 = arith.constant 0 : i32
    return %c0_i32, %c0_i32_0 : i32, i32
  }
  func.func @transform_3(%arg0: i32) -> (i32, i32) {
    %c0_i32 = arith.constant 0 : i32
    %c0_i32_0 = arith.constant 0 : i32
    %c0_i32_1 = arith.constant 0 : i32
    return %c0_i32, %c0_i32_0 : i32, i32
  }
  func.func @transform_4(%arg0: i32) -> (i32, i32) {
    %c0_i32 = arith.constant 0 : i32
    %c0_i32_0 = arith.constant 0 : i32
    %c0_i32_1 = arith.constant 0 : i32
    return %c0_i32, %c0_i32_0 : i32, i32
  }
  func.func @transform_5(%arg0: i32) -> (i32, i32) {
    %c0_i32 = arith.constant 0 : i32
    %c0_i32_0 = arith.constant 0 : i32
    %c0_i32_1 = arith.constant 0 : i32
    return %c0_i32, %c0_i32_0 : i32, i32
  }
  func.func @transform_6(%arg0: i32) -> (i32, i32) {
    %c0_i32 = arith.constant 0 : i32
    %c0_i32_0 = arith.constant 0 : i32
    %c0_i32_1 = arith.constant 0 : i32
    return %c0_i32, %c0_i32_0 : i32, i32
  }
  func.func @transform_7(%arg0: i32) -> (i32, i32) {
    %c0_i32 = arith.constant 0 : i32
    %c0_i32_0 = arith.constant 0 : i32
    %c0_i32_1 = arith.constant 0 : i32
    return %c0_i32, %c0_i32_0 : i32, i32
  }
  func.func @transform_8(%arg0: i32) -> (i32, i32) {
    %c0_i32 = arith.constant 0 : i32
    %c0_i32_0 = arith.constant 0 : i32
    %c0_i32_1 = arith.constant 0 : i32
    return %c0_i32, %c0_i32_0 : i32, i32
  }
  func.func @transform_9(%arg0: i32) -> (i32, i32, i32) {
    %c0_i32 = arith.constant 0 : i32
    %c0_i32_0 = arith.constant 0 : i32
    %c0_i32_1 = arith.constant 0 : i32
    return %arg0, %c0_i32, %c0_i32_0 : i32, i32, i32
  }
}

</mosaic_0001>

<bundles_post_ra>
// kernel: tpu_custom_call.1
= control target key start
LH: loop header
LB: loop body
LE: loop exit
PB: predicated region body
PF: predicated region fallthrough
CT: control target
= control target key end

     0   :  { %s1920_s0 = inlined_call_operand.vmem [shape: f32[2,8,3], index: 0, kind: input, shape index: {}]   ;;  %s1921_s1 = inlined_call_operand.vmem [shape: f32[3,256], index: 1, kind: input, shape index: {}]   ;;  %s1922_s2 = inlined_call_operand.vmem [shape: f32[1,256], index: 2, kind: input, shape index: {}]   ;;  %s1923_s3 = inlined_call_operand.hbm [shape: f32[128,128], index: 3, kind: input, shape index: {}]   ;;  %s1924_s4 = inlined_call_operand.hbm [shape: f32[128,128], index: 4, kind: input, shape index: {}]   ;;  %s1925_s5 = inlined_call_operand.hbm [shape: f32[128,128], index: 5, kind: input, shape index: {}]   ;;  %s1926_s6 = inlined_call_operand.vmem [shape: f32[1,128], index: 6, kind: input, shape index: {}]   ;;  %s1927_s7 = inlined_call_operand.vmem [shape: f32[1,128], index: 7, kind: input, shape index: {}]   ;;  %s1928_s8 = inlined_call_operand.<no memory space> [shape: f32[1,1], index: 8, kind: input, shape index: {}]   ;;  %s1929_s9 = inlined_call_operand.hbm [shape: f32[1,1,2], index: 9, kind: output, shape index: {}]  }
   0x1   :  { %v14_v0 = vstv %s1928_s8 }
   0x2   :  { %15 = vst [vmem:[#allocation2] sm:$0x1] %v14_v0 }
   0x3   :  { %16 = vsyncpa [#allocation4], 0 }
   0x4   :  { %17 = vsyncpa [#allocation7], 0 }
   0x5   :  { %18 = vsyncpa [#allocation5], 0  ;;  %s1587_s11 = smov [#allocation6]   ;;  %s1588_s13 = smov [#allocation3]  }
   0x6   :  { %s42_s12 = sshll.u32 %s1587_s11, 4  ;;  %s30_s14 = sshll.u32 %s1588_s13, 4  ;;  %s43_s12 = int_to_ptr.vmem [resolvable:$true] %s42_s12  ;;  %s1651_s14 = int_to_ptr.vmem [resolvable:$true] %s30_s14 }
   0x7   :  { %s1493_s17 = scalar_lea.hbm %s1924_s4, 2048 }
   0x8   :  { %p1494_p0 = scmp.ne.s32.totalorder %s1924_s4, %s1493_s17  ;;  %p1497_p1 = scmp.lt.u32.totalorder %s1493_s17, %s1924_s4 }
   0xa   :  { %p1499_p2 = pnand %p1497_p1, %p1494_p0 }
   0xc   :  { %1502 = shalt.err (!%p1499_p2)
}
   0xd   :  { %s1503_s21 = scalar_lea.vmem %s43_s12, 2048  ;;  %p1508_p4 = scmp.lt.s32.totalorder %s43_s12, %s43_s12 }
   0xe   :  { %p1504_p3 = scmp.ne.s32.totalorder %s43_s12, %s1503_s21  ;;  %p1509_p5 = scmp.lt.s32.totalorder %s1503_s21, %s1503_s21 }
  0x10   :  { %p1510_p6 = por %p1509_p5, %p1508_p4 }
  0x12   :  { %p1511_p7 = pnand %p1510_p6, %p1504_p3 }
  0x14   :  { %1514 = shalt.err (!%p1511_p7)
}
  0x15   :  { %s1589_s22 = smov 128   ;;  %s1590_s23 = smov 8  }
  0x16   :  { %48 = dma.hbm_to_vmem [thread:$0]  %s1924_s4, 2048, %s43_s12, [#allocation7], %s1589_s22, %s1589_s22, %s1590_s23  }
  0x17   :  { %s1515_s28 = scalar_lea.hbm %s1923_s3, 2048 }
  0x18   :  { %p1516_p8 = scmp.ne.s32.totalorder %s1923_s3, %s1515_s28  ;;  %p1519_p9 = scmp.lt.u32.totalorder %s1515_s28, %s1923_s3 }
  0x1a   :  { %p1521_p10 = pnand %p1519_p9, %p1516_p8 }
  0x1c   :  { %1524 = shalt.err (!%p1521_p10)
}
  0x1d   :  { %s1525_s13 = scalar_lea.vmem %s1651_s14, 2048  ;;  %p1530_p12 = scmp.lt.s32.totalorder %s1651_s14, %s1651_s14 }
  0x1e   :  { %p1526_p11 = scmp.ne.s32.totalorder %s1651_s14, %s1525_s13  ;;  %p1531_p13 = scmp.lt.s32.totalorder %s1525_s13, %s1525_s13 }
  0x20   :  { %p1532_p0 = por %p1531_p13, %p1530_p12 }
  0x22   :  { %p1533_p1 = pnand %p1532_p0, %p1526_p11 }
  0x24   :  { %1536 = shalt.err (!%p1533_p1)
}
  0x25   :  { %36 = dma.hbm_to_vmem [thread:$0]  %s1923_s3, 2048, %s1651_s14, [#allocation4], %s1589_s22, %s1589_s22, %s1590_s23  }
  0x26   :  { %s1591_s15 = smov [#allocation8]   ;;  %s1537_s19 = scalar_lea.hbm %s1925_s5, 2048 }
  0x27   :  { %s54_s16 = sshll.u32 %s1591_s15, 4  ;;  %p1538_p2 = scmp.ne.s32.totalorder %s1925_s5, %s1537_s19  ;;  %s55_s16 = int_to_ptr.vmem [resolvable:$true] %s54_s16 }
  0x28   :  { %p1541_p3 = scmp.lt.u32.totalorder %s1537_s19, %s1925_s5 }
  0x2a   :  { %p1543_p4 = pnand %p1541_p3, %p1538_p2 }
  0x2c   :  { %1546 = shalt.err (!%p1543_p4)
}
  0x2d   :  { %s1547_s25 = scalar_lea.vmem %s55_s16, 2048  ;;  %p1552_p6 = scmp.lt.s32.totalorder %s55_s16, %s55_s16 }
  0x2e   :  { %p1548_p5 = scmp.ne.s32.totalorder %s55_s16, %s1547_s25  ;;  %p1553_p7 = scmp.lt.s32.totalorder %s1547_s25, %s1547_s25 }
  0x30   :  { %p1554_p8 = por %p1553_p7, %p1552_p6 }
  0x32   :  { %p1555_p9 = pnand %p1554_p8, %p1548_p5 }
  0x34   :  { %1558 = shalt.err (!%p1555_p9)
}
  0x35   :  { %60 = dma.hbm_to_vmem [thread:$0]  %s1925_s5, 2048, %s55_s16, [#allocation7], %s1589_s22, %s1589_s22, %s1590_s23  }
  0x36   :  { %1581 = dma.done.wait [#allocation4], 2048  }
  0x37   :  { %1582 = vsyncadd [#allocation4], 4294965248 }
  0x38   :  { %1583 = dma.done.wait [#allocation7], 4096  }
  0x39   :  { %1584 = vsyncadd [#allocation7], 4294963200  ;;  %v1592_v1 = vmov 0.0   ;;  %v78_v2 = vld [vmem:[%s1921_s1] sm:$0x77]  ;;  %vm100_vm0 = vcmask 1042432   ;;  %v81_v30 = vlaneseq }
  0x3a   :  { %169 = vmatprep.mubr.f32.mxu0 %v1592_v1  ;;  %v92_v3 = vcombine.high %v78_v2, %v78_v2  ;;  %v182_v4 = vld [vmem:[#allocation3] sm:$0xff]  ;;  %v183_v5 = vld [vmem:[#allocation3 + $0x8] sm:$0xff]  ;;  %v184_v6 = vld [vmem:[#allocation3 + $0x10] sm:$0xff]  ;;  %vm93_vm1 = vcmask 23552   ;;  %v1593_v46 = vmov 0.0|0.0   ;;  %vm1594_vm2 = vmmov 0  }
  0x3b   :  { %v76_v7 = vld [vmem:[%s1920_s0] sm:$0xff]  ;;  %v1710_v8 = vpack.c.bf16 %v183_v5, %v182_v4  ;;  %v187_v12 = vld [vmem:[#allocation3 + $0x28] sm:$0xff]  ;;  %v188_v15 = vld [vmem:[#allocation3 + $0x30] sm:$0xff]  ;;  %v1750_v31 = vshrl.u32 %v81_v30, 7  ;;  %vm341_vm3 = vcmask 1041409   ;;  %vm914_vm4 = vcmask 1041408  }
  0x3c   :  { %v185_v9 = vld [vmem:[#allocation3 + $0x18] sm:$0xff]  ;;  %955 = vmatprep.subr.msk.mxu0 %vm100_vm0, %v92_v3  ;;  %v186_v11 = vld [vmem:[#allocation3 + $0x20] sm:$0xff]  ;;  %v191_v19 = vld [vmem:[#allocation3 + $0x48] sm:$0xff]  ;;  %vm937_vm5 = vcmask 8192  }
  0x3d   :  { %v1712_v10 = vpack.c.bf16 %v185_v9, %v184_v6  ;;  %956 = vmatpush1.msk.msra.mxu0 %vm100_vm0, %v78_v2  ;;  %1277 = vmatprep.subr.bf16.mxu1 %v1710_v8  ;;  %v77_v13 = vld [vmem:[%s1920_s0 + $0x8] sm:$0xff]  ;;  %v1722_v14 = vpack.c.bf16 %v187_v12, %v186_v11  ;;  %v189_v16 = vld [vmem:[#allocation3 + $0x38] sm:$0xff]  ;;  %v192_v21 = vld [vmem:[#allocation3 + $0x50] sm:$0xff]  ;;  %v87_v32 = vsub.s32 1, %v1750_v31 }
  0x3e   :  { %957 = vmatmul.mubr.msk.f32.vlgmr.msra.gmra.mrb[0].mxu0 %vm93_vm1, %v76_v7  ;;  %1279 = vmatpush3.bf16.msra.mxu1 %v1710_v8  ;;  %v1727_v17 = vpack.c.bf16 %v189_v16, %v188_v15  ;;  %v190_v18 = vld [vmem:[#allocation3 + $0x40] sm:$0xff]  ;;  %v193_v22 = vld [vmem:[#allocation3 + $0x58] sm:$0xff]  ;;  %v195_v25 = vld [vmem:[#allocation3 + $0x68] sm:$0xff] }
  0x3f   :  { %175 = vmatprep.mubr.f32.mxu0 %v1592_v1  ;;  %1281 = vmatprep.subr.bf16.mxu1 %v1712_v10  ;;  %v1732_v20 = vpack.c.bf16 %v191_v19, %v190_v18  ;;  %v1736_v23 = vpack.c.bf16 %v193_v22, %v192_v21  ;;  %v194_v24 = vld [vmem:[#allocation3 + $0x60] sm:$0xff]  ;;  %v196_v26 = vld [vmem:[#allocation3 + $0x70] sm:$0xff]  ;;  %v197_v28 = vld [vmem:[#allocation3 + $0x78] sm:$0xff] }
  0x40   :  { %v1740_v27 = vpack.c.bf16 %v195_v25, %v194_v24  ;;  %v1742_v29 = vpack.c.bf16 %v197_v28, %v196_v26  ;;  %v1756_v33 = vld [vmem:[%s1922_s2] sm:$0x3]  ;;  %v199_v44 = vld [vmem:[#allocation6 + $0x8] sm:$0xff]  ;;  %v200_v45 = vld [vmem:[#allocation6 + $0x10] sm:$0xff]  ;;  %1308 = vmatprep.subr.bf16.mxu0 %v1593_v46 }
  0x41   :  { %v88_v34 = vrot.slane %v1756_v33, %v87_v32  ;;  %v198_v43 = vld [vmem:[#allocation6] sm:$0xff]  ;;  %v201_v48 = vld [vmem:[#allocation6 + $0x18] sm:$0xff]  ;;  %v203_v51 = vld [vmem:[#allocation6 + $0x28] sm:$0xff] }
  0x42   :  { %958 = vmatmul.mubr.msk.f32.gmra.mrb[2].mxu0 %vm93_vm1, %v77_v13  ;;  %1283 = vmatpush3.bf16.msra.mxu1 %v1712_v10  ;;  %v1786_v47 = vpack.c.bf16 %v199_v44, %v198_v43  ;;  %v1791_v49 = vpack.c.bf16 %v201_v48, %v200_v45  ;;  %v202_v50 = vld [vmem:[#allocation6 + $0x20] sm:$0xff]  ;;  %v204_v53 = vld [vmem:[#allocation6 + $0x30] sm:$0xff]  ;;  %v205_v54 = vld [vmem:[#allocation6 + $0x38] sm:$0xff] }
  0x43   :  { %1285 = vmatprep.subr.bf16.mxu1 %v1722_v14  ;;  %1133 = vmatprep.mubr.msk.f32.mxu0 %vm1594_vm2, %v1592_v1  ;;  %v1795_v52 = vpack.c.bf16 %v203_v51, %v202_v50  ;;  %v1799_v55 = vpack.c.bf16 %v205_v54, %v204_v53  ;;  %v206_v56 = vld [vmem:[#allocation6 + $0x40] sm:$0xff]  ;;  %v207_v57 = vld [vmem:[#allocation6 + $0x48] sm:$0xff]  ;;  %v208_v59 = vld [vmem:[#allocation6 + $0x50] sm:$0xff] }
  0x44   :  { %1310 = vmatpush3.bf16.msra.mxu0 %v1786_v47  ;;  %v1803_v58 = vpack.c.bf16 %v207_v57, %v206_v56  ;;  %v209_v60 = vld [vmem:[#allocation6 + $0x58] sm:$0xff]  ;;  %v210_v62 = vld [vmem:[#allocation6 + $0x60] sm:$0xff]  ;;  %v211_v63 = vld [vmem:[#allocation6 + $0x68] sm:$0xff]  ;;  %v1821_v57 = vsub.s32 0, %v1750_v31 }
  0x45   :  { %1311 = vmatprep.subr.bf16.mxu0 %v1593_v46  ;;  %v1807_v61 = vpack.c.bf16 %v209_v60, %v208_v59  ;;  %v1811_v0 = vpack.c.bf16 %v211_v63, %v210_v62  ;;  %v212_v2 = vld [vmem:[#allocation6 + $0x70] sm:$0xff]  ;;  %v213_v3 = vld [vmem:[#allocation6 + $0x78] sm:$0xff] }
  0x46   :  { %1287 = vmatpush3.bf16.msra.mxu1 %v1722_v14  ;;  %v1815_v4 = vpack.c.bf16 %v213_v3, %v212_v2  ;;  %v84_v59 = vrot.slane %v1756_v33, %v1821_v57 }
  0x47   :  { %1289 = vmatprep.subr.bf16.mxu1 %v1727_v17 }
  0x48   :  { %1313 = vmatpush3.bf16.msra.mxu0 %v1791_v49 }
  0x49   :  { %1314 = vmatprep.subr.bf16.mxu0 %v1593_v46 }
  0x4a   :  { %1291 = vmatpush3.bf16.msra.mxu1 %v1727_v17 }
  0x4b   :  { %1293 = vmatprep.subr.bf16.mxu1 %v1732_v20 }
  0x4c   :  { %1316 = vmatpush3.bf16.msra.mxu0 %v1795_v52 }
  0x4d   :  { %1317 = vmatprep.subr.bf16.mxu0 %v1593_v46 }
  0x4e   :  { %1295 = vmatpush3.bf16.msra.mxu1 %v1732_v20 }
  0x4f   :  { %1297 = vmatprep.subr.bf16.mxu1 %v1736_v23 }
  0x50   :  { %1319 = vmatpush3.bf16.msra.mxu0 %v1799_v55 }
  0x51   :  { %1320 = vmatprep.subr.bf16.mxu0 %v1593_v46 }
  0x52   :  { %1299 = vmatpush3.bf16.msra.mxu1 %v1736_v23 }
  0x53   :  { %1301 = vmatprep.subr.bf16.mxu1 %v1740_v27 }
  0x54   :  { %1322 = vmatpush3.bf16.msra.mxu0 %v1803_v58 }
  0x55   :  { %1323 = vmatprep.subr.bf16.mxu0 %v1593_v46 }
  0x56   :  { %1303 = vmatpush3.bf16.msra.mxu1 %v1740_v27 }
  0x57   :  { %1305 = vmatprep.subr.bf16.mxu1 %v1742_v29 }
  0x58   :  { %1325 = vmatpush3.bf16.msra.mxu0 %v1807_v61 }
  0x59   :  { %1326 = vmatprep.subr.bf16.mxu0 %v1593_v46 }
  0x5a   :  { %1307 = vmatpush3.bf16.msra.mxu1 %v1742_v29 }
  0x5b   :  { %1333 = vmatprep.subr.bf16.mxu1 %v1710_v8 }
  0x5c   :  { %1328 = vmatpush3.bf16.msra.mxu0 %v1811_v0 }
  0x5d   :  { %1329 = vmatprep.subr.bf16.mxu0 %v1593_v46 }
  0x60   :  { %1331 = vmatpush3.bf16.msra.mxu0 %v1815_v4 }
  0x61   :  { %1364 = vmatprep.subr.bf16.mxu0 %v1593_v46 }
 0x111   :  { %v1759_v35 = vpop.f32.mrb[0].mxu0 }
 0x112   :  { %v173_v36 = vpop.f32.mrb[1].mxu0  ;;  %v1829_v3 = vadd.f32 %v1759_v35, %v84_v59 }
 0x113   :  { %v1761_v37 = vadd.f32 %v173_v36, %v88_v34 }
 0x115   :  { %v1763_v38 = vpop.f32.mrb[2].mxu0  ;;  %1457 = vtanh.f32 %v1761_v37 }
 0x116   :  { %v179_v39 = vpop.f32.mrb[3].mxu0  ;;  %v1826_v63 = vadd.f32 %v1763_v38, %v84_v59 }
 0x117   :  { %v1766_v40 = vadd.f32 %v179_v39, %v88_v34 }
 0x119   :  { %1459 = vtanh.f32 %v1766_v40 }
 0x11f   :  { %v1458_v41 = vpop.eup %1457 }
 0x120   :  { %1098 = vmatprep.mubr.f32.mxu1 %v1458_v41 }
 0x123   :  { %v1460_v42 = vpop.eup %1459 }
 0x124   :  { %1099 = vmatmul.mubr.f32.vlgmr.msra.gmra.mrb[0].mxu1 %v1460_v42 }
 0x125   :  { %1335 = vmatpush3.bf16.msra.mxu1 %v1710_v8 }
 0x126   :  { %1337 = vmatprep.subr.bf16.mxu1 %v1712_v10 }
 0x129   :  { %1339 = vmatpush3.bf16.msra.mxu1 %v1712_v10 }
 0x12a   :  { %1341 = vmatprep.subr.bf16.mxu1 %v1722_v14 }
 0x12d   :  { %1343 = vmatpush3.bf16.msra.mxu1 %v1722_v14 }
 0x12e   :  { %1345 = vmatprep.subr.bf16.mxu1 %v1727_v17 }
 0x131   :  { %1347 = vmatpush3.bf16.msra.mxu1 %v1727_v17 }
 0x132   :  { %1349 = vmatprep.subr.bf16.mxu1 %v1732_v20 }
 0x135   :  { %1351 = vmatpush3.bf16.msra.mxu1 %v1732_v20 }
 0x136   :  { %1353 = vmatprep.subr.bf16.mxu1 %v1736_v23 }
 0x139   :  { %1355 = vmatpush3.bf16.msra.mxu1 %v1736_v23 }
 0x13a   :  { %1357 = vmatprep.subr.bf16.mxu1 %v1740_v27 }
 0x13d   :  { %1359 = vmatpush3.bf16.msra.mxu1 %v1740_v27 }
 0x13e   :  { %1361 = vmatprep.subr.bf16.mxu1 %v1742_v29 }
 0x141   :  { %1363 = vmatpush3.bf16.msra.mxu1 %v1742_v29 }
 0x142   :  { %1389 = vmatprep.subr.bf16.mxu1 %v1710_v8 }
 0x1f7   :  { %v1100_v5 = vpop.f32.mrb[0].mxu1 }
 0x1f8   :  { %v297_v6 = vrot.slane %v1100_v5, 4  ;;  %v282_v7 = vpop.f32.mrb[1].mxu1 }
 0x1f9   :  { %v291_v9 = vrot.slane %v282_v7, 4 }
 0x1fa   :  { %v298_v11 = vmax.f32 %v1100_v5, %v297_v6 }
 0x1fb   :  { %v292_v12 = vmax.f32 %v282_v7, %v291_v9 }
 0x1fc   :  { %v299_v13 = vrot.slane %v298_v11, 2 }
 0x1fd   :  { %v293_v15 = vrot.slane %v292_v12, 2 }
 0x1fe   :  { %v300_v16 = vmax.f32 %v298_v11, %v299_v13 }
 0x1ff   :  { %v294_v18 = vmax.f32 %v292_v12, %v293_v15 }
 0x200   :  { %v301_v19 = vrot.slane %v300_v16, 1 }
 0x201   :  { %v295_v21 = vrot.slane %v294_v18, 1 }
 0x202   :  { %v302_v22 = vmax.f32 %v300_v16, %v301_v19 }
 0x203   :  { %v296_v24 = vmax.f32 %v294_v18, %v295_v21 }
 0x204   :  { %v304_v25 = vsub.f32 %v1100_v5, %v302_v22 }
 0x205   :  { %v303_v26 = vsub.f32 %v282_v7, %v296_v24 }
 0x206   :  { %v307_v28 = vmul.f32 1.442695, %v304_v25 }
 0x207   :  { %v305_v32 = vmul.f32 1.442695, %v303_v26 }
 0x208   :  { %1461 = vpow2.f32 %v307_v28 }
 0x209   :  { %1463 = vpow2.f32 %v305_v32 }
 0x212   :  { %v1462_v34 = vpop.eup %1461 }
 0x213   :  { %v1464_v36 = vpop.eup %1463  ;;  %v315_v39 = vrot.slane %v1462_v34, 4 }
 0x214   :  { %v309_v41 = vrot.slane %v1464_v36, 4 }
 0x215   :  { %v316_v42 = vadd.f32 %v1462_v34, %v315_v39 }
 0x216   :  { %v310_v43 = vadd.f32 %v1464_v36, %v309_v41 }
 0x217   :  { %v317_v44 = vrot.slane %v316_v42, 2 }
 0x218   :  { %v311_v45 = vrot.slane %v310_v43, 2 }
 0x219   :  { %v318_v48 = vadd.f32 %v317_v44, %v316_v42 }
 0x21a   :  { %v312_v50 = vadd.f32 %v311_v45, %v310_v43 }
 0x21b   :  { %v319_v51 = vrot.slane %v318_v48, 1 }
 0x21c   :  { %v313_v53 = vrot.slane %v312_v50, 1 }
 0x21d   :  { %v320_v54 = vadd.f32 %v319_v51, %v318_v48 }
 0x21e   :  { %v314_v56 = vadd.f32 %v313_v53, %v312_v50 }
 0x21f   :  { %1465 = vrcp.f32 %v320_v54 }
 0x220   :  { %1467 = vrcp.f32 %v314_v56 }
 0x229   :  { %v1466_v60 = vpop.eup %1465 }
 0x22a   :  { %v1468_v62 = vpop.eup %1467  ;;  %v324_v2 = vmul.f32 %v1466_v60, %v1462_v34 }
 0x22b   :  { %v323_v5 = vmul.f32 %v1468_v62, %v1464_v36 }
 0x22c   :  { %v326_v6 = vmul.f32 %v324_v2, %v1826_v63 }
 0x22d   :  { %v325_v7 = vmul.f32 %v323_v5, %v1829_v3 }
 0x22e   :  { %v333_v9 = vrot.slane %v326_v6, 4 }
 0x22f   :  { %v327_v11 = vrot.slane %v325_v7, 4 }
 0x230   :  { %v334_v12 = vadd.f32 %v333_v9, %v326_v6 }
 0x231   :  { %v328_v13 = vadd.f32 %v327_v11, %v325_v7 }
 0x232   :  { %v335_v15 = vrot.slane %v334_v12, 2 }
 0x233   :  { %v329_v33 = vrot.slane %v328_v13, 2 }
 0x234   :  { %v336_v16 = vadd.f32 %v335_v15, %v334_v12 }
 0x235   :  { %v330_v18 = vadd.f32 %v329_v33, %v328_v13 }
 0x236   :  { %v337_v19 = vrot.slane %v336_v16, 1 }
 0x237   :  { %v331_v38 = vrot.slane %v330_v18, 1 }
 0x238   :  { %v338_v21 = vadd.f32 %v337_v19, %v336_v16 }
 0x239   :  { %v332_v22 = vadd.f32 %v331_v38, %v330_v18 }
 0x23b   :  { %v342_v35 = vsel %vm341_vm3, %v338_v21, %v332_v22 }
 0x23c   :  { %1134 = vmatmul.mubr.f32.vlgmr.msra.gmra.mrb[4].mxu0 %v342_v35 }
 0x23d   :  { %1366 = vmatpush3.bf16.msra.mxu0 %v1786_v47  ;;  %1203 = vmatprep.mubr.msk.f32.mxu0 %vm1594_vm2, %v1592_v1  ;;  %v1595_v47 = vmov 1966171168  }
 0x23e   :  { %1367 = vmatprep.subr.bf16.mxu0 %v1593_v46 }
 0x241   :  { %1369 = vmatpush3.bf16.msra.mxu0 %v1791_v49  ;;  %v416_v49 = vunpack.c.l.s4 %v1595_v47 }
 0x242   :  { %1370 = vmatprep.subr.bf16.mxu0 %v1593_v46 }
 0x245   :  { %1372 = vmatpush3.bf16.msra.mxu0 %v1795_v52  ;;  %v417_v52 = vunpack.c.0.s8 %v416_v49 }
 0x246   :  { %1373 = vmatprep.subr.bf16.mxu0 %v1593_v46 }
 0x249   :  { %1375 = vmatpush3.bf16.msra.mxu0 %v1799_v55  ;;  %v1853_v55 = vsub.s32 %v417_v52, %v1750_v31 }
 0x24a   :  { %1376 = vmatprep.subr.bf16.mxu0 %v1593_v46 }
 0x24d   :  { %1378 = vmatpush3.bf16.msra.mxu0 %v1803_v58 }
 0x24e   :  { %1379 = vmatprep.subr.bf16.mxu0 %v1593_v46 }
 0x251   :  { %1381 = vmatpush3.bf16.msra.mxu0 %v1807_v61 }
 0x252   :  { %1382 = vmatprep.subr.bf16.mxu0 %v1593_v46 }
 0x255   :  { %1384 = vmatpush3.bf16.msra.mxu0 %v1811_v0 }
 0x256   :  { %1385 = vmatprep.subr.bf16.mxu0 %v1593_v46 }
 0x259   :  { %1387 = vmatpush3.bf16.msra.mxu0 %v1815_v4 }
 0x25a   :  { %1420 = vmatprep.subr.bf16.mxu0 %v1593_v46 }
 0x30f   :  { %v410_v58 = vpop.f32.mrb[4].mxu0 }
 0x310   :  { %v421_v24 = vrot.slane %v410_v58, %v1853_v55  ;;  %v1135_v61 = vpop.f32.mrb[5].mxu0 }
 0x312   :  { %v422_v25 = vcombine.high %v421_v24, %v421_v24  ;;  %v429_v26 = vrot.slane %v421_v24, %v1853_v55 }
 0x314   :  { %v436_v0 = vrot.slane %v422_v25, %v1853_v55  ;;  %v440_v28 = vrot.slane %v429_v26, %v1821_v57 }
 0x316   :  { %v444_v4 = vrot.slane %v436_v0, %v1821_v57  ;;  %v447_v32 = vadd.f32 %v440_v28, %v1761_v37 }
 0x318   :  { %v448_v34 = vadd.f32 %v444_v4, %v1766_v40  ;;  %1469 = vtanh.f32 %v447_v32 }
 0x31a   :  { %1471 = vtanh.f32 %v448_v34 }
 0x322   :  { %v1470_v36 = vpop.eup %1469 }
 0x323   :  { %1168 = vmatprep.mubr.f32.mxu1 %v1470_v36 }
 0x324   :  { %v1472_v39 = vpop.eup %1471 }
 0x325   :  { %1169 = vmatmul.mubr.f32.vlgmr.msra.gmra.mrb[2].mxu1 %v1472_v39 }
 0x326   :  { %1391 = vmatpush3.bf16.msra.mxu1 %v1710_v8 }
 0x327   :  { %1393 = vmatprep.subr.bf16.mxu1 %v1712_v10 }
 0x32a   :  { %1395 = vmatpush3.bf16.msra.mxu1 %v1712_v10 }
 0x32b   :  { %1397 = vmatprep.subr.bf16.mxu1 %v1722_v14 }
 0x32e   :  { %1399 = vmatpush3.bf16.msra.mxu1 %v1722_v14 }
 0x32f   :  { %1401 = vmatprep.subr.bf16.mxu1 %v1727_v17 }
 0x332   :  { %1403 = vmatpush3.bf16.msra.mxu1 %v1727_v17 }
 0x333   :  { %1405 = vmatprep.subr.bf16.mxu1 %v1732_v20 }
 0x336   :  { %1407 = vmatpush3.bf16.msra.mxu1 %v1732_v20 }
 0x337   :  { %1409 = vmatprep.subr.bf16.mxu1 %v1736_v23 }
 0x33a   :  { %1411 = vmatpush3.bf16.msra.mxu1 %v1736_v23 }
 0x33b   :  { %1413 = vmatprep.subr.bf16.mxu1 %v1740_v27 }
 0x33e   :  { %1415 = vmatpush3.bf16.msra.mxu1 %v1740_v27 }
 0x33f   :  { %1417 = vmatprep.subr.bf16.mxu1 %v1742_v29 }
 0x342   :  { %1419 = vmatpush3.bf16.msra.mxu1 %v1742_v29 }
 0x3f8   :  { %v1170_v8 = vpop.f32.mrb[2].mxu1 }
 0x3f9   :  { %v532_v10 = vrot.slane %v1170_v8, 4  ;;  %v517_v14 = vpop.f32.mrb[3].mxu1 }
 0x3fa   :  { %v526_v17 = vrot.slane %v517_v14, 4 }
 0x3fb   :  { %v533_v41 = vmax.f32 %v1170_v8, %v532_v10 }
 0x3fc   :  { %v527_v42 = vmax.f32 %v517_v14, %v526_v17 }
 0x3fd   :  { %v534_v43 = vrot.slane %v533_v41, 2 }
 0x3fe   :  { %v528_v20 = vrot.slane %v527_v42, 2 }
 0x3ff   :  { %v535_v44 = vmax.f32 %v533_v41, %v534_v43 }
 0x400   :  { %v529_v45 = vmax.f32 %v527_v42, %v528_v20 }
 0x401   :  { %v536_v48 = vrot.slane %v535_v44, 1 }
 0x402   :  { %v530_v23 = vrot.slane %v529_v45, 1 }
 0x403   :  { %v537_v50 = vmax.f32 %v535_v44, %v536_v48  ;;  %v808_v44 = vld [vmem:[#allocation8] sm:$0xff]  ;;  %v810_v48 = vld [vmem:[#allocation8 + $0x10] sm:$0xff] }
 0x404   :  { %v531_v51 = vmax.f32 %v529_v45, %v530_v23  ;;  %v809_v45 = vld [vmem:[#allocation8 + $0x8] sm:$0xff] }
 0x405   :  { %v539_v53 = vsub.f32 %v1170_v8, %v537_v50  ;;  %v1421_v23 = vpack.c.bf16 %v809_v45, %v808_v44  ;;  %v811_v50 = vld [vmem:[#allocation8 + $0x18] sm:$0xff] }
 0x406   :  { %v538_v27 = vsub.f32 %v517_v14, %v531_v51  ;;  %v812_v51 = vld [vmem:[#allocation8 + $0x20] sm:$0xff] }
 0x407   :  { %v542_v54 = vmul.f32 1.442695, %v539_v53  ;;  %v813_v53 = vld [vmem:[#allocation8 + $0x28] sm:$0xff] }
 0x408   :  { %v540_v56 = vmul.f32 1.442695, %v538_v27  ;;  %v815_v27 = vld [vmem:[#allocation8 + $0x38] sm:$0xff] }
 0x409   :  { %1473 = vpow2.f32 %v542_v54 }
 0x40a   :  { %1475 = vpow2.f32 %v540_v56  ;;  %v816_v56 = vld [vmem:[#allocation8 + $0x40] sm:$0xff] }
 0x413   :  { %v1474_v29 = vpop.eup %1473 }
 0x414   :  { %v1476_v59 = vpop.eup %1475  ;;  %v550_v60 = vrot.slane %v1474_v29, 4 }
 0x415   :  { %v544_v62 = vrot.slane %v1476_v59, 4 }
 0x416   :  { %v551_v2 = vadd.f32 %v1474_v29, %v550_v60  ;;  %v818_v60 = vld [vmem:[#allocation8 + $0x50] sm:$0xff] }
 0x417   :  { %v545_v5 = vadd.f32 %v1476_v59, %v544_v62  ;;  %v819_v62 = vld [vmem:[#allocation8 + $0x58] sm:$0xff] }
 0x418   :  { %v552_v6 = vrot.slane %v551_v2, 2 }
 0x419   :  { %v546_v7 = vrot.slane %v545_v5, 2 }
 0x41a   :  { %v553_v9 = vadd.f32 %v552_v6, %v551_v2  ;;  %v1436_v2 = vpack.c.bf16 %v819_v62, %v818_v60  ;;  %v821_v6 = vld [vmem:[#allocation8 + $0x68] sm:$0xff]  ;;  %v1596_v62 = vmov 0  }
 0x41b   :  { %v547_v11 = vadd.f32 %v546_v7, %v545_v5  ;;  %v820_v5 = vld [vmem:[#allocation8 + $0x60] sm:$0xff]  ;;  %1455 = vset.pattern.permute.xlu0 %v1596_v62 }
 0x41c   :  { %v554_v12 = vrot.slane %v553_v9, 1  ;;  %v1439_v7 = vpack.c.bf16 %v821_v6, %v820_v5  ;;  %v960_v6 = vld [vmem:[%s1927_s7] ss:$0 sm:$0xff] }
 0x41d   :  { %v548_v13 = vrot.slane %v547_v11, 1 }
 0x41e   :  { %v555_v15 = vadd.f32 %v554_v12, %v553_v9  ;;  %v822_v9 = vld [vmem:[#allocation8 + $0x70] sm:$0xff] }
 0x41f   :  { %v549_v33 = vadd.f32 %v548_v13, %v547_v11  ;;  %v823_v11 = vld [vmem:[#allocation8 + $0x78] sm:$0xff] }
 0x420   :  { %1477 = vrcp.f32 %v555_v15  ;;  %v1442_v12 = vpack.c.bf16 %v823_v11, %v822_v9 }
 0x421   :  { %1479 = vrcp.f32 %v549_v33 }
 0x42a   :  { %v1478_v16 = vpop.eup %1477 }
 0x42b   :  { %v1480_v18 = vpop.eup %1479  ;;  %v559_v19 = vmul.f32 %v1478_v16, %v1474_v29  ;;  %v817_v29 = vld [vmem:[#allocation8 + $0x48] sm:$0xff] }
 0x42c   :  { %v558_v38 = vmul.f32 %v1480_v18, %v1476_v59  ;;  %v1433_v59 = vpack.c.bf16 %v817_v29, %v816_v56 }
 0x42d   :  { %v561_v21 = vmul.f32 %v559_v19, %v1826_v63 }
 0x42e   :  { %v560_v22 = vmul.f32 %v558_v38, %v1829_v3 }
 0x42f   :  { %v568_v35 = vrot.slane %v561_v21, 4 }
 0x430   :  { %v562_v47 = vrot.slane %v560_v22, 4 }
 0x431   :  { %v569_v49 = vadd.f32 %v568_v35, %v561_v21 }
 0x432   :  { %v563_v52 = vadd.f32 %v562_v47, %v560_v22 }
 0x433   :  { %v570_v58 = vrot.slane %v569_v49, 2 }
 0x434   :  { %v564_v24 = vrot.slane %v563_v52, 2 }
 0x435   :  { %v571_v61 = vadd.f32 %v570_v58, %v569_v49 }
 0x436   :  { %v565_v25 = vadd.f32 %v564_v24, %v563_v52 }
 0x437   :  { %v572_v26 = vrot.slane %v571_v61, 1 }
 0x438   :  { %v566_v0 = vrot.slane %v565_v25, 1 }
 0x439   :  { %v573_v28 = vadd.f32 %v572_v26, %v571_v61 }
 0x43a   :  { %v567_v4 = vadd.f32 %v566_v0, %v565_v25 }
 0x43c   :  { %v576_v32 = vsel %vm341_vm3, %v573_v28, %v567_v4 }
 0x43d   :  { %1204 = vmatmul.mubr.f32.vlgmr.msra.gmra.mrb[6].mxu0 %v576_v32 }
 0x43e   :  { %1273 = vmatprep.mubr.msk.f32.mxu0 %vm1594_vm2, %v1592_v1  ;;  %1422 = vmatpush3.bf16.msra.mxu0 %v1421_v23 }
 0x43f   :  { %1423 = vmatprep.subr.bf16.mxu0 %v1593_v46 }
 0x510   :  { %v644_v34 = vpop.f32.mrb[6].mxu0 }
 0x511   :  { %v655_v36 = vrot.slane %v644_v34, %v1853_v55  ;;  %v1205_v39 = vpop.f32.mrb[7].mxu0 }
 0x513   :  { %v656_v8 = vcombine.high %v655_v36, %v655_v36  ;;  %v663_v10 = vrot.slane %v655_v36, %v1853_v55 }
 0x515   :  { %v670_v14 = vrot.slane %v656_v8, %v1853_v55  ;;  %v674_v17 = vrot.slane %v663_v10, %v1821_v57  ;;  %v1424_v55 = vpack.c.bf16 %v811_v50, %v810_v48 }
 0x517   :  { %v678_v41 = vrot.slane %v670_v14, %v1821_v57  ;;  %v681_v42 = vadd.f32 %v674_v17, %v1761_v37  ;;  %1425 = vmatpush3.bf16.msra.mxu0 %v1424_v55  ;;  %v1427_v37 = vpack.c.bf16 %v813_v53, %v812_v51 }
 0x518   :  { %1426 = vmatprep.subr.bf16.mxu0 %v1593_v46 }
 0x519   :  { %v682_v43 = vadd.f32 %v678_v41, %v1766_v40  ;;  %1481 = vtanh.f32 %v681_v42  ;;  %v814_v40 = vld [vmem:[#allocation8 + $0x30] sm:$0xff] }
 0x51a   :  { %v1430_v54 = vpack.c.bf16 %v815_v27, %v814_v40 }
 0x51b   :  { %1483 = vtanh.f32 %v682_v43  ;;  %1428 = vmatpush3.bf16.msra.mxu0 %v1427_v37 }
 0x51c   :  { %1429 = vmatprep.subr.bf16.mxu0 %v1593_v46 }
 0x51f   :  { %1431 = vmatpush3.bf16.msra.mxu0 %v1430_v54 }
 0x520   :  { %1432 = vmatprep.subr.bf16.mxu0 %v1593_v46 }
 0x523   :  { %v1482_v1 = vpop.eup %1481  ;;  %1434 = vmatpush3.bf16.msra.mxu0 %v1433_v59 }
 0x524   :  { %1238 = vmatprep.mubr.f32.mxu1 %v1482_v1  ;;  %1435 = vmatprep.subr.bf16.mxu0 %v1593_v46 }
 0x525   :  { %v1484_v20 = vpop.eup %1483 }
 0x526   :  { %1239 = vmatmul.mubr.f32.vlgmr.msra.gmra.mrb[4].mxu1 %v1484_v20 }
 0x527   :  { %1437 = vmatpush3.bf16.msra.mxu0 %v1436_v2 }
 0x528   :  { %1438 = vmatprep.subr.bf16.mxu0 %v1593_v46 }
 0x52b   :  { %1440 = vmatpush3.bf16.msra.mxu0 %v1439_v7 }
 0x52c   :  { %1441 = vmatprep.subr.bf16.mxu0 %v1593_v46 }
 0x52f   :  { %1443 = vmatpush3.bf16.msra.mxu0 %v1442_v12  ;;  %v918_v12 = vld [vmem:[#allocation2] sm:$0x1] }
 0x5f9   :  { %v1240_v13 = vpop.f32.mrb[4].mxu1 }
 0x5fa   :  { %v766_v15 = vrot.slane %v1240_v13, 4  ;;  %v751_v33 = vpop.f32.mrb[5].mxu1 }
 0x5fb   :  { %v760_v16 = vrot.slane %v751_v33, 4 }
 0x5fc   :  { %v767_v18 = vmax.f32 %v1240_v13, %v766_v15  ;;  %v931_v15 = vand.u32 127, %v81_v30 }
 0x5fd   :  { %v761_v19 = vmax.f32 %v751_v33, %v760_v16 }
 0x5fe   :  { %v768_v38 = vrot.slane %v767_v18, 2  ;;  %v934_v16 = vsub.s32 %v931_v15, %v1750_v31 }
 0x5ff   :  { %v762_v21 = vrot.slane %v761_v19, 2 }
 0x600   :  { %v769_v22 = vmax.f32 %v767_v18, %v768_v38 }
 0x601   :  { %v763_v35 = vmax.f32 %v761_v19, %v762_v21 }
 0x602   :  { %v770_v47 = vrot.slane %v769_v22, 1 }
 0x603   :  { %v764_v49 = vrot.slane %v763_v35, 1 }
 0x604   :  { %v771_v52 = vmax.f32 %v769_v22, %v770_v47 }
 0x605   :  { %v765_v58 = vmax.f32 %v763_v35, %v764_v49 }
 0x606   :  { %v773_v24 = vsub.f32 %v1240_v13, %v771_v52 }
 0x607   :  { %v772_v61 = vsub.f32 %v751_v33, %v765_v58 }
 0x608   :  { %v776_v25 = vmul.f32 1.442695, %v773_v24 }
 0x609   :  { %v774_v26 = vmul.f32 1.442695, %v772_v61 }
 0x60a   :  { %1485 = vpow2.f32 %v776_v25 }
 0x60b   :  { %1487 = vpow2.f32 %v774_v26 }
 0x614   :  { %v1486_v46 = vpop.eup %1485 }
 0x615   :  { %v1488_v0 = vpop.eup %1487  ;;  %v784_v28 = vrot.slane %v1486_v46, 4 }
 0x616   :  { %v778_v4 = vrot.slane %v1488_v0, 4 }
 0x617   :  { %v785_v32 = vadd.f32 %v1486_v46, %v784_v28 }
 0x618   :  { %v779_v34 = vadd.f32 %v1488_v0, %v778_v4 }
 0x619   :  { %v786_v36 = vrot.slane %v785_v32, 2 }
 0x61a   :  { %v780_v39 = vrot.slane %v779_v34, 2 }
 0x61b   :  { %v787_v8 = vadd.f32 %v786_v36, %v785_v32 }
 0x61c   :  { %v781_v10 = vadd.f32 %v780_v39, %v779_v34 }
 0x61d   :  { %v788_v14 = vrot.slane %v787_v8, 1 }
 0x61e   :  { %v782_v17 = vrot.slane %v781_v10, 1 }
 0x61f   :  { %v789_v41 = vadd.f32 %v788_v14, %v787_v8 }
 0x620   :  { %v783_v42 = vadd.f32 %v782_v17, %v781_v10 }
 0x621   :  { %1489 = vrcp.f32 %v789_v41 }
 0x622   :  { %1491 = vrcp.f32 %v783_v42 }
 0x62b   :  { %v1490_v43 = vpop.eup %1489 }
 0x62c   :  { %v1492_v1 = vpop.eup %1491  ;;  %v793_v20 = vmul.f32 %v1490_v43, %v1486_v46 }
 0x62d   :  { %v792_v44 = vmul.f32 %v1492_v1, %v1488_v0 }
 0x62e   :  { %v795_v45 = vmul.f32 %v793_v20, %v1826_v63  ;;  %v959_v63 = vld [vmem:[%s1926_s6] ss:$0 sm:$0xff]  ;;  %s1597_s6 = smov [#allocation9]  }
 0x62f   :  { %v794_v48 = vmul.f32 %v792_v44, %v1829_v3  ;;  %s945_s11 = sshll.u32 %s1597_s6, 4  ;;  %s946_s11 = int_to_ptr.vmem [resolvable:$true] %s945_s11 }
 0x630   :  { %v802_v23 = vrot.slane %v795_v45, 4  ;;  %s1559_s7 = scalar_lea.vmem %s946_s11, 16  ;;  %s1563_s13 = scalar_lea.vmem %s946_s11, 32 }
 0x631   :  { %v796_v50 = vrot.slane %v794_v48, 4  ;;  %p1560_p10 = scmp.ne.s32.totalorder %s946_s11, %s1559_s7  ;;  %p1564_p11 = scmp.lt.s32.totalorder %s946_s11, %s946_s11 }
 0x632   :  { %v803_v55 = vadd.f32 %v802_v23, %v795_v45  ;;  %p1565_p12 = scmp.lt.s32.totalorder %s1563_s13, %s1559_s7 }
 0x633   :  { %v797_v51 = vadd.f32 %v796_v50, %v794_v48 }
 0x634   :  { %v804_v53 = vrot.slane %v803_v55, 2  ;;  %p1566_p13 = por %p1565_p12, %p1564_p11 }
 0x635   :  { %v798_v37 = vrot.slane %v797_v51, 2 }
 0x636   :  { %v805_v40 = vadd.f32 %v804_v53, %v803_v55  ;;  %p1567_p0 = pnand %p1566_p13, %p1560_p10 }
 0x637   :  { %v799_v27 = vadd.f32 %v798_v37, %v797_v51 }
 0x638   :  { %v806_v54 = vrot.slane %v805_v40, 1 }
 0x639   :  { %v800_v56 = vrot.slane %v799_v27, 1 }
 0x63a   :  { %v807_v29 = vadd.f32 %v806_v54, %v805_v40 }
 0x63b   :  { %v801_v59 = vadd.f32 %v800_v56, %v799_v27 }
 0x63d   :  { %v833_v60 = vsel %vm341_vm3, %v807_v29, %v801_v59 }
 0x63e   :  { %1274 = vmatmul.mubr.f32.vlgmr.msra.gmra.mrb[8].mxu0 %v833_v60 }
 0x711   :  { %v901_v3 = vpop.f32.mrb[8].mxu0 }
 0x712   :  { %v902_v2 = vadd.f32 %v959_v63, %v901_v3  ;;  %v1275_v5 = vpop.f32.mrb[9].mxu0 }
 0x714   :  { %v905_v7 = vmax.f32 %v902_v2, 0.0 }
 0x716   :  { %v913_v9 = vmul.f32 %v960_v6, %v905_v7 }
 0x718   :  { %v915_v11 = vsel %vm914_vm4, %v913_v9, 0.0 }
 0x719   :  { %916 = vadd.xlane.f32.xlu0 %v915_v11 }
 0x72f   :  { %921 = vperm.xlu0 %1455, %v918_v12  }
 0x7a6   :  { %v917_v13 = vpop.xlane.xlu0 %916 }
 0x7ae   :  { %v922_v33 = vpop.permute.xlu0 %921 }
 0x7af   :  { %v927_v18 = vrot.slane %v922_v33, %v1821_v57 }
 0x7b1   :  { %v928_v19 = vadd.f32 %v927_v18, %v917_v13 }
 0x7b3   :  { %v935_v38 = vrot.slane %v928_v19, %v934_v16 }
 0x7b5   :  { %938 = vst.msk [vmem:[#allocation9] sm:$0x1] %vm937_vm5, %v935_v38 }
 0x7b6   :  { %1570 = shalt.err (!%p1567_p0)
}
 0x7b7   :  { %s1571_s15 = scalar_lea.hbm %s1929_s9, 16 }
 0x7b8   :  { %p1572_p1 = scmp.ne.s32.totalorder %s1929_s9, %s1571_s15  ;;  %p1575_p2 = scmp.lt.u32.totalorder %s1571_s15, %s1929_s9 }
 0x7ba   :  { %p1577_p3 = pnand %p1575_p2, %p1572_p1 }
 0x7bc   :  { %1580 = shalt.err (!%p1577_p3)
}
 0x7bd   :  { %948 = dma.vmem_to_hbm [thread:$0]  %s946_s11, 16, %s1929_s9, [#allocation5]  }
 0x7be   :  { %1585 = dma.done.wait [#allocation5], 16  }
 0x7bf   :  { %1586 = vsyncadd [#allocation5], 4294967280 }
 0x7c0   :  { %952 = vsyncpa [#allocation4], 1 }
 0x7c1   :  { %953 = vsyncpa [#allocation7], 1 }
 0x7c2   :  { %954 = vsyncpa [#allocation5], 1 }

</bundles_post_ra>
